<compile_context>
chip_gen: v7x
topology: tpu7x:2x2x1
jax: 0.10.0
libtpu: 0.0.40
codegen_flags: <defaults>
</compile_context>

<pallas_src>
import functools

import jax
import jax.numpy as jnp
from jax.experimental import pallas as pl
from jax.experimental.pallas import tpu as pltpu

H1 = 128       # fc1 output width (already lane-dense)
H2 = 64        # fc2 output width
H2_PAD = 128   # fc2 width padded 64 -> 128 (zero pad, inert)
W_PAD = 128    # lane width of the stacked w2/w3 + biases


def _round_up(x, m):
    return ((x + m - 1) // m) * m


def _mlp_kernel(x_ref, w1_ref, w23_ref, b_ref, out_ref, *, nb_action):
    """Fused fc1+ReLU -> fc2+ReLU -> fc3 on one batch tile.

    x_ref:   (TB, in_size)   f32   batch tile (pipelined, no lane padding)
    w1_ref:  (in_size, 128)  bf16  resident
    w23_ref: (2, 128, 128)   bf16  resident; [0]=w2 (cols padded), [1]=w3 (rows/cols padded)
    b_ref:   (3, 1, 128)     f32   resident; b1, b2 (padded), b3 (padded)
    out_ref: (TB, nb_action) f32   narrow Q-value store
    """
    x = x_ref[...].astype(jnp.bfloat16)                                   # (TB, in)

    h1 = jnp.dot(x, w1_ref[...], preferred_element_type=jnp.float32) + b_ref[0]
    h1 = jnp.maximum(h1, 0.0).astype(jnp.bfloat16)                        # (TB, 128)

    h2 = jnp.dot(h1, w23_ref[0], preferred_element_type=jnp.float32) + b_ref[1]
    h2 = jnp.maximum(h2, 0.0).astype(jnp.bfloat16)                        # (TB, 128); cols 64.. == 0

    q = jnp.dot(h2, w23_ref[1], preferred_element_type=jnp.float32) + b_ref[2]
    out_ref[...] = q[:, :nb_action]                                       # (TB, nb_action)


def init_params(key, input_size, nb_action):
    """nn.Linear-style init U(-1/sqrt(fan_in), +1/sqrt(fan_in)); (in, out) layout."""
    def linear(k, fan_in, fan_out):
        kw, kb = jax.random.split(k)
        bound = 1.0 / jnp.sqrt(jnp.float32(fan_in))
        w = jax.random.uniform(kw, (fan_in, fan_out), jnp.float32, -bound, bound)
        b = jax.random.uniform(kb, (1, fan_out), jnp.float32, -bound, bound)
        return w, b

    k1, k2, k3 = jax.random.split(key, 3)
    w1, b1 = linear(k1, input_size, H1)
    w2, b2 = linear(k2, H1, H2)
    w3, b3 = linear(k3, H2, nb_action)
    return {"w1": w1, "b1": b1, "w2": w2, "b2": b2, "w3": w3, "b3": b3}


def pack_params(params, input_size, nb_action):
    """Pack/pad params once (MUST be re-run after any parameter update).

    - w1 keeps its natural (input_size, 128) shape so the state is never
      lane-padded (the kernel does the K=input_size contraction directly).
    - w2/w3 are zero-padded to (128, 128) and stacked -> single resident DMA.
    - biases are zero-padded to 128 lanes and stacked -> single resident DMA.
    All zero pads are mathematically inert for this MLP.
    """
    assert nb_action <= W_PAD, "nb_action must be <= 128 for this packing"
    w1 = params["w1"].astype(jnp.bfloat16)                                    # (in, 128)
    w2 = jnp.pad(params["w2"], ((0, 0), (0, H2_PAD - H2)))                    # (128, 128)
    w3 = jnp.pad(params["w3"], ((0, H2_PAD - H2), (0, W_PAD - nb_action)))    # (128, 128)
    w23 = jnp.stack([w2, w3]).astype(jnp.bfloat16)                            # (2, 128, 128)
    b1 = params["b1"]                                                         # (1, 128)
    b2 = jnp.pad(params["b2"], ((0, 0), (0, H2_PAD - H2)))                    # (1, 128)
    b3 = jnp.pad(params["b3"], ((0, 0), (0, W_PAD - nb_action)))              # (1, 128)
    b = jnp.stack([b1, b2, b3]).astype(jnp.float32)                           # (3, 1, 128)
    return {"w1": w1, "w23": w23, "b": b}


@functools.partial(jax.jit, static_argnames=("nb_action", "tb"))
def network_forward(state, packed, *, nb_action, tb=2048):
    """state: (batch, input_size) f32 -> (batch, nb_action) f32 Q-values."""
    batch, in_size = state.shape

    # --- tile / grid selection ------------------------------------------------
    #  * big default tile amortizes the ~0.35 us/grid-step overhead
    #  * tiles are balanced so the last block isn't mostly padding
    #  * >=2 grid steps for large batches so both v7x TensorCores are used
    min_tiles = 2 if batch >= 1024 else 1
    num_tiles = max(pl.cdiv(batch, tb), min_tiles)
    tb_eff = _round_up(pl.cdiv(batch, num_tiles), 8)
    num_tiles = pl.cdiv(batch, tb_eff)
    b_pad = num_tiles * tb_eff

    x = state if b_pad == batch else jnp.pad(state, ((0, b_pad - batch), (0, 0)))

    kernel = functools.partial(_mlp_kernel, nb_action=nb_action)

    flops = 2 * b_pad * (in_size * H1 + H1 * H2_PAD + H2_PAD * W_PAD)
    bytes_accessed = (
        b_pad * in_size * 4 + b_pad * nb_action * 4
        + packed["w1"].size * 2 + packed["w23"].size * 2 + packed["b"].size * 4
    )

    out = pl.pallas_call(
        kernel,
        out_shape=jax.ShapeDtypeStruct((b_pad, nb_action), jnp.float32),
        grid=(num_tiles,),
        in_specs=[
            pl.BlockSpec((tb_eff, in_size), lambda i: (i, 0)),       # state tile (pipelined)
            pl.BlockSpec((in_size, H1), lambda i: (0, 0)),           # w1 (resident)
            pl.BlockSpec((2, H2_PAD, W_PAD), lambda i: (0, 0, 0)),   # w2|w3 stack (resident)
            pl.BlockSpec((3, 1, W_PAD), lambda i: (0, 0, 0)),        # biases (resident)
        ],
        out_specs=pl.BlockSpec((tb_eff, nb_action), lambda i: (i, 0)),
        compiler_params=pltpu.CompilerParams(
            dimension_semantics=("parallel",),        # megacore sharding on v7x
            vmem_limit_bytes=32 * 1024 * 1024,        # explicit (v5e default is 16 MiB)
        ),
        cost_estimate=pl.CostEstimate(
            flops=flops, transcendentals=0, bytes_accessed=bytes_accessed),
    )(x, packed["w1"], packed["w23"], packed["b"])

    return out if b_pad == batch else out[:batch]


def network_forward_ref_bf16(state, packed, nb_action):
    """Bit-matched reference (same bf16-in / f32-acc recipe as the kernel)."""
    x = state.astype(jnp.bfloat16)
    h1 = jnp.maximum(
        jnp.dot(x, packed["w1"], preferred_element_type=jnp.float32) + packed["b"][0], 0.0
    ).astype(jnp.bfloat16)
    h2 = jnp.maximum(
        jnp.dot(h1, packed["w23"][0], preferred_element_type=jnp.float32) + packed["b"][1], 0.0
    ).astype(jnp.bfloat16)
    q = jnp.dot(h2, packed["w23"][1], preferred_element_type=jnp.float32) + packed["b"][2]
    return q[:, :nb_action]


def network_forward_ref_f32(state, p):
    h1 = jnp.maximum(state @ p["w1"] + p["b1"], 0.0)
    h2 = jnp.maximum(h1 @ p["w2"] + p["b2"], 0.0)
    return h2 @ p["w3"] + p["b3"]


if __name__ == "__main__":
    key = jax.random.PRNGKey(0)
    k_params, k_state, k_state2 = jax.random.split(key, 3)

    input_size, nb_action = 16, 4
    params = init_params(k_params, input_size, nb_action)
    packed = pack_params(params, input_size, nb_action)

    # --- small batch: single grid step ---------------------------------------
    batch = 8
    state = jax.random.normal(k_state, (batch, input_size), jnp.float32)
    q = jax.block_until_ready(network_forward(state, packed, nb_action=nb_action))
    assert q.shape == (batch, nb_action)

    q_ref = network_forward_ref_bf16(state, packed, nb_action)
    assert jnp.allclose(q, q_ref, atol=2e-2, rtol=2e-2), "mismatch vs bf16 reference"
    q_f32 = network_forward_ref_f32(state, params)
    assert jnp.allclose(q, q_f32, atol=5e-2, rtol=5e-2), "mismatch vs f32 reference"

    # --- batch not a tile multiple: balanced single tile (no over-padding) ----
    batch2 = 300
    state2 = jax.random.normal(k_state2, (batch2, input_size), jnp.float32)
    q2 = jax.block_until_ready(network_forward(state2, packed, nb_action=nb_action))
    assert q2.shape == (batch2, nb_action)
    q2_ref = network_forward_ref_bf16(state2, packed, nb_action)
    assert jnp.allclose(q2, q2_ref, atol=2e-2, rtol=2e-2), "mismatch (batched) vs bf16 ref"

    # --- force a multi-step grid to exercise the pipelined / megacore path ----
    q3 = jax.block_until_ready(
        network_forward(state2, packed, nb_action=nb_action, tb=128))
    assert q3.shape == (batch2, nb_action)
    assert jnp.allclose(q3, q2_ref, atol=2e-2, rtol=2e-2), "mismatch (multi-tile) vs bf16 ref"

    print("KERNEL_OK")
</pallas_src>

<mosaic_0001>
module attributes {stable_mosaic.version = 11 : i64} {
  func.func @_mlp_kernel(%arg0: i32, %arg1: memref<8x16xf32, #tpu.memory_space<vmem>>, %arg2: memref<16x128xbf16, #tpu.memory_space<vmem>>, %arg3: memref<2x128x128xbf16, #tpu.memory_space<vmem>>, %arg4: memref<3x1x128xf32, #tpu.memory_space<vmem>>, %arg5: memref<8x4xf32, #tpu.memory_space<vmem>>) attributes {dimension_semantics = [#tpu.dimension_semantics<parallel>], iteration_bounds = array<i64: 1>, scalar_prefetch = 0 : i64, scratch_operands = 0 : i64, tpu.core_type = #tpu.core_type<tc>, window_params = [{transform_indices = @transform_0, window_bounds = array<i64: 8, 16>}, {pipeline_mode = #tpu.pipeline_mode<synchronous>, transform_indices = @transform_1, window_bounds = array<i64: 16, 128>}, {pipeline_mode = #tpu.pipeline_mode<synchronous>, transform_indices = @transform_2, window_bounds = array<i64: 2, 128, 128>}, {pipeline_mode = #tpu.pipeline_mode<synchronous>, transform_indices = @transform_3, window_bounds = array<i64: 3, 1, 128>}, {transform_indices = @transform_4, window_bounds = array<i64: 8, 4>}]} {
    %c0 = arith.constant 0 : index
    %c0_0 = arith.constant 0 : index
    %0 = vector.load %arg1[%c0, %c0_0] : memref<8x16xf32, #tpu.memory_space<vmem>>, vector<8x16xf32>
    %1 = arith.truncf %0 : vector<8x16xf32> to vector<8x16xbf16>
    %c0_1 = arith.constant 0 : index
    %c0_2 = arith.constant 0 : index
    %2 = vector.load %arg2[%c0_1, %c0_2] : memref<16x128xbf16, #tpu.memory_space<vmem>>, vector<16x128xbf16>
    %cst = arith.constant dense<0.000000e+00> : vector<8x128xf32>
    %3 = tpu.matmul %1, %2, %cst {dimension_numbers = #tpu.dot_dimension_numbers<[1], [0], [0], [1], [0, 0, 1, 1], [], []>} : vector<8x16xbf16>, vector<16x128xbf16>, vector<8x128xf32> -> vector<8x128xf32>
    %c0_3 = arith.constant 0 : index
    %c0_4 = arith.constant 0 : index
    %c0_5 = arith.constant 0 : index
    %4 = vector.load %arg4[%c0_3, %c0_4, %c0_5] : memref<3x1x128xf32, #tpu.memory_space<vmem>>, vector<1x1x128xf32>
    %5 = vector.shape_cast %4 : vector<1x1x128xf32> to vector<1x128xf32>
    %6 = vector.broadcast %5 : vector<1x128xf32> to vector<8x128xf32>
    %7 = arith.addf %3, %6 : vector<8x128xf32>
    %cst_6 = arith.constant 0.000000e+00 : f32
    %8 = vector.broadcast %cst_6 : f32 to vector<8x128xf32>
    %9 = arith.maximumf %7, %8 : vector<8x128xf32>
    %10 = arith.truncf %9 : vector<8x128xf32> to vector<8x128xbf16>
    %c0_7 = arith.constant 0 : index
    %c0_8 = arith.constant 0 : index
    %c0_9 = arith.constant 0 : index
    %11 = vector.load %arg3[%c0_7, %c0_8, %c0_9] : memref<2x128x128xbf16, #tpu.memory_space<vmem>>, vector<1x128x128xbf16>
    %12 = vector.shape_cast %11 : vector<1x128x128xbf16> to vector<128x128xbf16>
    %cst_10 = arith.constant dense<0.000000e+00> : vector<8x128xf32>
    %13 = tpu.matmul %10, %12, %cst_10 {dimension_numbers = #tpu.dot_dimension_numbers<[1], [0], [0], [1], [0, 0, 1, 1], [], []>} : vector<8x128xbf16>, vector<128x128xbf16>, vector<8x128xf32> -> vector<8x128xf32>
    %c1 = arith.constant 1 : index
    %c0_11 = arith.constant 0 : index
    %c0_12 = arith.constant 0 : index
    %14 = vector.load %arg4[%c1, %c0_11, %c0_12] : memref<3x1x128xf32, #tpu.memory_space<vmem>>, vector<1x1x128xf32>
    %15 = vector.shape_cast %14 : vector<1x1x128xf32> to vector<1x128xf32>
    %16 = vector.broadcast %15 : vector<1x128xf32> to vector<8x128xf32>
    %17 = arith.addf %13, %16 : vector<8x128xf32>
    %cst_13 = arith.constant 0.000000e+00 : f32
    %18 = vector.broadcast %cst_13 : f32 to vector<8x128xf32>
    %19 = arith.maximumf %17, %18 : vector<8x128xf32>
    %20 = arith.truncf %19 : vector<8x128xf32> to vector<8x128xbf16>
    %c1_14 = arith.constant 1 : index
    %c0_15 = arith.constant 0 : index
    %c0_16 = arith.constant 0 : index
    %21 = vector.load %arg3[%c1_14, %c0_15, %c0_16] : memref<2x128x128xbf16, #tpu.memory_space<vmem>>, vector<1x128x128xbf16>
    %22 = vector.shape_cast %21 : vector<1x128x128xbf16> to vector<128x128xbf16>
    %cst_17 = arith.constant dense<0.000000e+00> : vector<8x128xf32>
    %23 = tpu.matmul %20, %22, %cst_17 {dimension_numbers = #tpu.dot_dimension_numbers<[1], [0], [0], [1], [0, 0, 1, 1], [], []>} : vector<8x128xbf16>, vector<128x128xbf16>, vector<8x128xf32> -> vector<8x128xf32>
    %c2 = arith.constant 2 : index
    %c0_18 = arith.constant 0 : index
    %c0_19 = arith.constant 0 : index
    %24 = vector.load %arg4[%c2, %c0_18, %c0_19] : memref<3x1x128xf32, #tpu.memory_space<vmem>>, vector<1x1x128xf32>
    %25 = vector.shape_cast %24 : vector<1x1x128xf32> to vector<1x128xf32>
    %26 = vector.broadcast %25 : vector<1x128xf32> to vector<8x128xf32>
    %27 = arith.addf %23, %26 : vector<8x128xf32>
    %28 = vector.extract_strided_slice %27 {offsets = [0, 0], sizes = [8, 4], strides = [1, 1]} : vector<8x128xf32> to vector<8x4xf32>
    %c0_20 = arith.constant 0 : index
    %c0_21 = arith.constant 0 : index
    %29 = vector.load %arg5[%c0_20, %c0_21] : memref<8x4xf32, #tpu.memory_space<vmem>>, vector<8x4xf32>
    tpu.vector_store %arg5[%c0_20, %c0_21], %28 {strides = array<i32>} : memref<8x4xf32, #tpu.memory_space<vmem>>, vector<8x4xf32>,
    return
  }
  func.func @transform_0(%arg0: i32) -> (i32, i32) {
    %c0_i32 = arith.constant 0 : i32
    %c0_i32_0 = arith.constant 0 : i32
    return %arg0, %c0_i32 : i32, i32
  }
  func.func @transform_1(%arg0: i32) -> (i32, i32) {
    %c0_i32 = arith.constant 0 : i32
    %c0_i32_0 = arith.constant 0 : i32
    %c0_i32_1 = arith.constant 0 : i32
    return %c0_i32, %c0_i32_0 : i32, i32
  }
  func.func @transform_2(%arg0: i32) -> (i32, i32, i32) {
    %c0_i32 = arith.constant 0 : i32
    %c0_i32_0 = arith.constant 0 : i32
    %c0_i32_1 = arith.constant 0 : i32
    %c0_i32_2 = arith.constant 0 : i32
    return %c0_i32, %c0_i32_0, %c0_i32_1 : i32, i32, i32
  }
  func.func @transform_3(%arg0: i32) -> (i32, i32, i32) {
    %c0_i32 = arith.constant 0 : i32
    %c0_i32_0 = arith.constant 0 : i32
    %c0_i32_1 = arith.constant 0 : i32
    %c0_i32_2 = arith.constant 0 : i32
    return %c0_i32, %c0_i32_0, %c0_i32_1 : i32, i32, i32
  }
  func.func @transform_4(%arg0: i32) -> (i32, i32) {
    %c0_i32 = arith.constant 0 : i32
    %c0_i32_0 = arith.constant 0 : i32
    return %arg0, %c0_i32 : i32, i32
  }
}

</mosaic_0001>

<bundles_post_ra>
// kernel: network_forward.1
= control target key start
LH: loop header
LB: loop body
LE: loop exit
PB: predicated region body
PF: predicated region fallthrough
CT: control target
= control target key end

     0   :  { %9 = vsyncpa [#allocation3], 0  ;;  %s644_s0 = inlined_call_operand.hbm [shape: f32[8,16], index: 0, kind: input, shape index: {}]   ;;  %s645_s1 = inlined_call_operand.hbm [shape: bf16[16,128], index: 1, kind: input, shape index: {}]   ;;  %s646_s2 = inlined_call_operand.hbm [shape: bf16[2,128,128], index: 2, kind: input, shape index: {}]   ;;  %s647_s3 = inlined_call_operand.vmem [shape: f32[3,1,128], index: 3, kind: input, shape index: {}]   ;;  %s648_s4 = inlined_call_operand.vmem [shape: f32[8,4], index: 4, kind: output, shape index: {}]  }
   0x1   :  { %10 = vsyncpa [#allocation5], 0  ;;  %s538_s15 = smov [#allocation4]   ;;  %s468_s19 = scalar_lea.hbm %s645_s1, 128 }
   0x2   :  { %s26_s16 = sshll.u32 %s538_s15, 4  ;;  %p469_p0 = scmp.ne.s32.totalorder %s645_s1, %s468_s19  ;;  %s27_s16 = int_to_ptr.vmem [resolvable:$true] %s26_s16 }
   0x3   :  { %p472_p1 = scmp.lt.u32.totalorder %s468_s19, %s645_s1 }
   0x5   :  { %p474_p2 = pnand %p472_p1, %p469_p0 }
   0x7   :  { %477 = shalt.err (!%p474_p2)
}
   0x8   :  { %s478_s24 = scalar_lea.vmem %s27_s16, 128  ;;  %p483_p4 = scmp.lt.s32.totalorder %s27_s16, %s27_s16 }
   0x9   :  { %p479_p3 = scmp.ne.s32.totalorder %s27_s16, %s478_s24  ;;  %p484_p5 = scmp.lt.s32.totalorder %s478_s24, %s478_s24 }
   0xb   :  { %p485_p6 = por %p484_p5, %p483_p4 }
   0xd   :  { %p486_p7 = pnand %p485_p6, %p479_p3 }
   0xf   :  { %489 = shalt.err (!%p486_p7)
}
  0x10   :  { %s539_s25 = smov 64   ;;  %s540_s26 = smov 4  }
  0x11   :  { %32 = dma.hbm_to_vmem [thread:$0]  %s645_s1, 128, %s27_s16, [#allocation5], %s539_s25, %s539_s25, %s540_s26  }
  0x12   :  { %s541_s29 = smov [#allocation2]   ;;  %s542_s5 = smov [#allocation6]  }
  0x13   :  { %s17_s30 = sshll.u32 %s541_s29, 4  ;;  %s38_s6 = sshll.u32 %s542_s5, 4  ;;  %s18_s30 = int_to_ptr.vmem [resolvable:$true] %s17_s30  ;;  %s39_s6 = int_to_ptr.vmem [resolvable:$true] %s38_s6 }
  0x14   :  { %s490_s9 = scalar_lea.hbm %s644_s0, 128 }
  0x15   :  { %p491_p8 = scmp.ne.s32.totalorder %s644_s0, %s490_s9  ;;  %p494_p9 = scmp.lt.u32.totalorder %s490_s9, %s644_s0 }
  0x17   :  { %p496_p10 = pnand %p494_p9, %p491_p8 }
  0x19   :  { %499 = shalt.err (!%p496_p10)
}
  0x1a   :  { %s500_s1 = scalar_lea.vmem %s18_s30, 128  ;;  %p505_p12 = scmp.lt.s32.totalorder %s18_s30, %s18_s30 }
  0x1b   :  { %p501_p11 = scmp.ne.s32.totalorder %s18_s30, %s500_s1  ;;  %p506_p13 = scmp.lt.s32.totalorder %s500_s1, %s500_s1 }
  0x1d   :  { %p507_p0 = por %p506_p13, %p505_p12 }
  0x1f   :  { %p508_p1 = pnand %p507_p0, %p501_p11 }
  0x21   :  { %511 = shalt.err (!%p508_p1)
}
  0x22   :  { %20 = dma.hbm_to_vmem [thread:$0]  %s644_s0, 128, %s18_s30, [#allocation3]  }
  0x23   :  { %s512_s18 = scalar_lea.hbm %s646_s2, 2048 }
  0x24   :  { %p513_p2 = scmp.ne.s32.totalorder %s646_s2, %s512_s18  ;;  %p516_p3 = scmp.lt.u32.totalorder %s512_s18, %s646_s2 }
  0x26   :  { %p518_p4 = pnand %p516_p3, %p513_p2 }
  0x28   :  { %521 = shalt.err (!%p518_p4)
}
  0x29   :  { %s522_s23 = scalar_lea.vmem %s39_s6, 2048  ;;  %p527_p6 = scmp.lt.s32.totalorder %s39_s6, %s39_s6 }
  0x2a   :  { %p523_p5 = scmp.ne.s32.totalorder %s39_s6, %s522_s23  ;;  %p528_p7 = scmp.lt.s32.totalorder %s522_s23, %s522_s23 }
  0x2c   :  { %p529_p8 = por %p528_p7, %p527_p6 }
  0x2e   :  { %p530_p9 = pnand %p529_p8, %p523_p5 }
  0x30   :  { %533 = shalt.err (!%p530_p9)
}
  0x31   :  { %44 = dma.hbm_to_vmem [thread:$0]  %s646_s2, 2048, %s39_s6, [#allocation5], %s539_s25, %s539_s25, %s540_s26  }
  0x32   :  { %534 = dma.done.wait [#allocation3], 128  }
  0x33   :  { %535 = vsyncadd [#allocation3], 4294967168 }
  0x34   :  { %536 = dma.done.wait [#allocation5], 2176  }
  0x35   :  { %537 = vsyncadd [#allocation5], 4294965120  ;;  %v543_v0 = vmov 0.0   ;;  %vm544_vm0 = vmmov 0   ;;  %v451_v1 = vld [vmem:[#allocation4] sm:$0xff]   ;;  %v57_v2 = vld [vmem:[#allocation2] sm:$0xff] }
  0x36   :  { %398 = vmatprep.subr.bf16.mxu0 %v543_v0  ;;  %400 = vmatprep.mubr.msk.bf16.mxu0 %vm544_vm0, %v543_v0  ;;  %v58_v3 = vpack.c.bf16 %v57_v2, %v57_v2  ;;  %vm74_vm1 = vcmask 130048   ;;  %v452_v4 = vld [vmem:[#allocation6] sm:$0xff]   ;;  %v453_v5 = vld [vmem:[#allocation6 + $0x8] sm:$0xff]   ;;  %v454_v6 = vld [vmem:[#allocation6 + $0x10] sm:$0xff]   ;;  %vm347_vm2 = vcmask 31744  }
  0x37   :  { %404 = vmatprep.subr.bf16.mxu1 %v543_v0  ;;  %420 = vmatprep.mubr.msk.bf16.mxu1 %vm544_vm0, %v543_v0  ;;  %v455_v7 = vld [vmem:[#allocation6 + $0x18] sm:$0xff]   ;;  %v456_v8 = vld [vmem:[#allocation6 + $0x20] sm:$0xff]   ;;  %v457_v9 = vld [vmem:[#allocation6 + $0x28] sm:$0xff]  }
  0x38   :  { %399 = vmatpush3.bf16.msra.mxu0 %v451_v1  ;;  %405 = vmatpush3.bf16.msra.mxu1 %v452_v4  ;;  %v458_v10 = vld [vmem:[#allocation6 + $0x30] sm:$0xff]   ;;  %v459_v11 = vld [vmem:[#allocation6 + $0x38] sm:$0xff]   ;;  %v460_v12 = vld [vmem:[#allocation6 + $0x40] sm:$0xff]  }
  0x39   :  { %424 = vmatprep.subr.bf16.mxu0 %v543_v0  ;;  %406 = vmatprep.subr.bf16.mxu1 %v543_v0  ;;  %v461_v13 = vld [vmem:[#allocation6 + $0x48] sm:$0xff]   ;;  %v462_v14 = vld [vmem:[#allocation6 + $0x50] sm:$0xff]   ;;  %v463_v15 = vld [vmem:[#allocation6 + $0x58] sm:$0xff]  }
  0x3a   :  { %v464_v16 = vld [vmem:[#allocation6 + $0x60] sm:$0xff]   ;;  %v465_v17 = vld [vmem:[#allocation6 + $0x68] sm:$0xff]   ;;  %v466_v26 = vld [vmem:[#allocation6 + $0x70] sm:$0xff]  }
  0x3b   :  { %401 = vmatmul.mubr.msk.bf16.vlgmr.msra.gmra.mrb[0].mxu0 %vm74_vm1, %v58_v3  ;;  %v355_v18 = vld [vmem:[%s647_s3] ss:$0 sm:$0xff]  ;;  %v467_v27 = vld [vmem:[#allocation6 + $0x78] sm:$0xff]   ;;  %v359_v28 = vld [vmem:[%s647_s3 + $0x1] ss:$0 sm:$0xff] }
  0x3c   :  { %440 = vmatprep.mubr.msk.bf16.mxu0 %vm544_vm0, %v543_v0  ;;  %407 = vmatpush3.bf16.msra.mxu1 %v453_v5  ;;  %v369_v36 = vld [vmem:[%s647_s3 + $0x2] ss:$0 sm:$0xff] }
  0x3d   :  { %408 = vmatprep.subr.bf16.mxu1 %v543_v0  ;;  %425 = vmatpush3.bf16.msra.mxu0 %v460_v12 }
  0x3e   :  { %426 = vmatprep.subr.bf16.mxu0 %v543_v0 }
  0x40   :  { %409 = vmatpush3.bf16.msra.mxu1 %v454_v6 }
  0x41   :  { %410 = vmatprep.subr.bf16.mxu1 %v543_v0  ;;  %427 = vmatpush3.bf16.msra.mxu0 %v461_v13 }
  0x42   :  { %428 = vmatprep.subr.bf16.mxu0 %v543_v0 }
  0x44   :  { %411 = vmatpush3.bf16.msra.mxu1 %v455_v7 }
  0x45   :  { %412 = vmatprep.subr.bf16.mxu1 %v543_v0  ;;  %429 = vmatpush3.bf16.msra.mxu0 %v462_v14 }
  0x46   :  { %430 = vmatprep.subr.bf16.mxu0 %v543_v0 }
  0x48   :  { %413 = vmatpush3.bf16.msra.mxu1 %v456_v8 }
  0x49   :  { %414 = vmatprep.subr.bf16.mxu1 %v543_v0  ;;  %431 = vmatpush3.bf16.msra.mxu0 %v463_v15 }
  0x4a   :  { %432 = vmatprep.subr.bf16.mxu0 %v543_v0 }
  0x4c   :  { %415 = vmatpush3.bf16.msra.mxu1 %v457_v9 }
  0x4d   :  { %416 = vmatprep.subr.bf16.mxu1 %v543_v0  ;;  %433 = vmatpush3.bf16.msra.mxu0 %v464_v16 }
  0x4e   :  { %434 = vmatprep.subr.bf16.mxu0 %v543_v0 }
  0x50   :  { %417 = vmatpush3.bf16.msra.mxu1 %v458_v10 }
  0x51   :  { %418 = vmatprep.subr.bf16.mxu1 %v543_v0  ;;  %435 = vmatpush3.bf16.msra.mxu0 %v465_v17 }
  0x52   :  { %436 = vmatprep.subr.bf16.mxu0 %v543_v0 }
  0x54   :  { %419 = vmatpush3.bf16.msra.mxu1 %v459_v11 }
  0x55   :  { %437 = vmatpush3.bf16.msra.mxu0 %v466_v26 }
  0x56   :  { %438 = vmatprep.subr.bf16.mxu0 %v543_v0 }
  0x59   :  { %439 = vmatpush3.bf16.msra.mxu0 %v467_v27 }
 0x10e   :  { %v112_v19 = vpop.f32.mrb[0].mxu0 }
 0x10f   :  { %v113_v20 = vadd.f32 %v355_v18, %v112_v19  ;;  %v402_v21 = vpop.f32.mrb[1].mxu0 }
 0x110   :  { %v115_v22 = vpop.f32.mrb[2].mxu0 }
 0x111   :  { %v118_v23 = vmax.f32 %v113_v20, 0.0  ;;  %v403_v24 = vpop.f32.mrb[3].mxu0 }
 0x113   :  { %v119_v25 = vpack.c.bf16 %v118_v23, %v118_v23 }
 0x115   :  { %421 = vmatmul.mubr.bf16.vlgmr.msra.gmra.mrb[0].mxu1 %v119_v25 }
 0x1e8   :  { %v226_v29 = vpop.f32.mrb[0].mxu1 }
 0x1e9   :  { %v227_v30 = vadd.f32 %v359_v28, %v226_v29  ;;  %v422_v31 = vpop.f32.mrb[1].mxu1 }
 0x1ea   :  { %v229_v32 = vpop.f32.mrb[2].mxu1 }
 0x1eb   :  { %v232_v33 = vmax.f32 %v227_v30, 0.0  ;;  %v423_v34 = vpop.f32.mrb[3].mxu1 }
 0x1ed   :  { %v233_v35 = vpack.c.bf16 %v232_v33, %v232_v33 }
 0x1ef   :  { %441 = vmatmul.mubr.bf16.vlgmr.msra.gmra.mrb[4].mxu0 %v233_v35 }
 0x2c2   :  { %v341_v37 = vpop.f32.mrb[4].mxu0 }
 0x2c3   :  { %v342_v38 = vadd.f32 %v369_v36, %v341_v37  ;;  %v442_v39 = vpop.f32.mrb[5].mxu0 }
 0x2c4   :  { %v344_v40 = vpop.f32.mrb[6].mxu0 }
 0x2c5   :  { %348 = vst.msk [vmem:[%s648_s4] sm:$0xff] %vm347_vm2, %v342_v38  ;;  %v443_v41 = vpop.f32.mrb[7].mxu0 }
 0x2c6   :  { %353 = vsyncpa [#allocation3], 1 }
 0x2c7   :  { %354 = vsyncpa [#allocation5], 1 }

</bundles_post_ra>
